<compile_context>
chip_gen: v5e
topology: v5e:2x2
jax: 0.10.0
libtpu: 0.0.40
codegen_flags: <defaults>
</compile_context>

<pallas_src>
import jax
import jax.numpy as jnp
from jax.experimental import pallas as pl
from jax.experimental.pallas import tpu as pltpu

# --- model dims (from the PyTorch module) ---
N_IN = 3        # state = (z, x, vx)
N_HIDDEN = 5
N_ACTION = 2    # env = Control_landing_env_continuous(np.array([2]), 0) -> n_action = 2
N_LAYERS = 4
FAN_INS = (N_IN, N_HIDDEN, N_HIDDEN, N_HIDDEN)   # per-layer contraction length

# --- TPU tiling ---
F_SUB = 8       # features padded to one sublane tile
TB = 256        # batch lanes per grid step (multiple of 128)


def _dqn_kernel(x_ref, w_ref, b_ref, o_ref):
    """Fused 4-layer MLP forward for one batch tile (batch on LANES).

    x_ref: (F_SUB, TB)          states, feature-major (rows 0..2 = z, x, vx)
    w_ref: (4, F_SUB, F_SUB)    packed weights, PyTorch (out, in) layout, zero-padded
    b_ref: (4, F_SUB, 1) f32    packed biases, zero-padded
    o_ref: (F_SUB, TB) f32      Q-values in rows 0..N_ACTION-1
    """
    h = x_ref[...].astype(jnp.float32)              # upcast once; all math in f32
    for k in range(N_LAYERS):                       # static unroll -> layers stay fused
        fan_in = FAN_INS[k]
        # z[out, b] = sum_in W[out, in] * h[in, b]  -- tiny contraction on the VPU:
        # lane-broadcast weight column (8,1) * sublane-broadcast activation row (1,TB).
        z = w_ref[k, :, 0:1].astype(jnp.float32) * h[0:1, :]
        for i in range(1, fan_in):
            z = z + w_ref[k, :, i:i + 1].astype(jnp.float32) * h[i:i + 1, :]
        h = jnp.tanh(z + b_ref[k])                  # (8,1) bias lane-broadcasts
    o_ref[...] = h.astype(o_ref.dtype)


def _pad2d(a, rows, cols):
    r, c = a.shape
    return jnp.pad(a, ((0, rows - r), (0, cols - c)))


def prepare_params(params, dtype=jnp.bfloat16):
    """One-time packing of PyTorch-layout params (W: (out, in), b: (out,)).

    Returns:
      w_packed: (4, F_SUB, F_SUB) `dtype`  -- PyTorch (out, in) layout, zero-padded.
      b_packed: (4, F_SUB, 1)     float32  -- zero-padded column biases.
    """
    ws, bs = [], []
    for i in range(1, N_LAYERS + 1):
        w = jnp.asarray(params[f"w{i}"], jnp.float32)          # (out, in)
        b = jnp.asarray(params[f"b{i}"], jnp.float32)          # (out,)
        ws.append(_pad2d(w, F_SUB, F_SUB).astype(dtype))
        bs.append(jnp.pad(b, (0, F_SUB - b.shape[0]))[:, None])  # (F_SUB, 1)
    return jnp.stack(ws), jnp.stack(bs).astype(jnp.float32)


@jax.jit
def dqn_forward(x, w_packed, b_packed):
    """x: (B, 3). Returns (B, N_ACTION) float32 Q-values."""
    B = x.shape[0]
    n_tiles = pl.cdiv(B, TB)
    B_pad = n_tiles * TB

    # Feature-major layout (F_SUB, B_pad): only 5 padded feature rows, batch
    # padded up to a lane-tile multiple.  ~16x smaller than the old (B,128) pad.
    x_t = jnp.pad(x.astype(w_packed.dtype).T,
                  ((0, F_SUB - N_IN), (0, B_pad - B)))

    out_p = pl.pallas_call(
        _dqn_kernel,
        out_shape=jax.ShapeDtypeStruct((F_SUB, B_pad), jnp.float32),
        grid=(n_tiles,),
        in_specs=[
            pl.BlockSpec((F_SUB, TB), lambda i: (0, i)),                  # x tile
            pl.BlockSpec((N_LAYERS, F_SUB, F_SUB), lambda i: (0, 0, 0)),  # weights (grid-invariant, 512 B)
            pl.BlockSpec((N_LAYERS, F_SUB, 1), lambda i: (0, 0, 0)),      # biases  (grid-invariant, 128 B)
        ],
        out_specs=pl.BlockSpec((F_SUB, TB), lambda i: (0, i)),
        compiler_params=pltpu.CompilerParams(
            dimension_semantics=("parallel",)),    # shards batch tiles across TCs on v7x
    )(x_t, w_packed, b_packed)

    return out_p[:N_ACTION, :B].T


def init_params(key):
    """Deterministic init mimicking PyTorch Linear default (U(-1/sqrt(fan_in), ..))."""
    dims = [(N_HIDDEN, N_IN), (N_HIDDEN, N_HIDDEN),
            (N_HIDDEN, N_HIDDEN), (N_ACTION, N_HIDDEN)]
    params = {}
    for i, (fan_out, fan_in) in enumerate(dims, start=1):
        key, kw, kb = jax.random.split(key, 3)
        bound = 1.0 / (fan_in ** 0.5)
        params[f"w{i}"] = jax.random.uniform(
            kw, (fan_out, fan_in), jnp.float32, -bound, bound)
        params[f"b{i}"] = jax.random.uniform(
            kb, (fan_out,), jnp.float32, -bound, bound)
    return params


def dqn_forward_ref(x, params):
    """Pure-JAX reference (mirrors the PyTorch forward; full-f32 matmuls)."""
    hp = jax.lax.Precision.HIGHEST
    h = jnp.tanh(jnp.dot(x, params["w1"].T, precision=hp) + params["b1"])
    h = jnp.tanh(jnp.dot(h, params["w2"].T, precision=hp) + params["b2"])
    h = jnp.tanh(jnp.dot(h, params["w3"].T, precision=hp) + params["b3"])
    return jnp.tanh(jnp.dot(h, params["w4"].T, precision=hp) + params["b4"])


if __name__ == "__main__":
    key = jax.random.PRNGKey(0)
    key, kx1, kx2 = jax.random.split(key, 3)

    params = init_params(key)
    # One-time packing (hoisted out of the per-call path).
    w_bf16, b_bf16 = prepare_params(params)                       # bf16 default
    w_f32, b_f32 = prepare_params(params, dtype=jnp.float32)      # tight-tolerance path

    # Small single-tile batch of states (z, x, vx).
    x_small = jax.random.normal(kx1, (4, N_IN), jnp.float32)
    ref_small = dqn_forward_ref(x_small, params)
    out_small = jax.block_until_ready(dqn_forward(x_small, w_bf16, b_bf16))
    assert out_small.shape == (4, N_ACTION)
    assert jnp.allclose(out_small, ref_small, atol=5e-2)          # bf16 storage tolerance
    out_small_f32 = jax.block_until_ready(dqn_forward(x_small, w_f32, b_f32))
    assert jnp.allclose(out_small_f32, ref_small, atol=1e-4)      # f32 path is (near-)exact

    # Replay-buffer-sized batch (non-multiple of TB -> exercises grid + padding).
    x_big = jax.random.normal(kx2, (600, N_IN), jnp.float32)
    ref_big = dqn_forward_ref(x_big, params)
    out_big = jax.block_until_ready(dqn_forward(x_big, w_bf16, b_bf16))
    assert out_big.shape == (600, N_ACTION)
    assert jnp.allclose(out_big, ref_big, atol=5e-2)
    out_big_f32 = jax.block_until_ready(dqn_forward(x_big, w_f32, b_f32))
    assert jnp.allclose(out_big_f32, ref_big, atol=1e-4)

    print("KERNEL_OK")
</pallas_src>

<mosaic_0001>
module attributes {stable_mosaic.version = 11 : i64} {
  func.func @_dqn_kernel(%arg0: i32, %arg1: memref<8x256xbf16, #tpu.memory_space<vmem>>, %arg2: memref<4x8x8xbf16, #tpu.memory_space<vmem>>, %arg3: memref<4x8x1xf32, #tpu.memory_space<vmem>>, %arg4: memref<8x256xf32, #tpu.memory_space<vmem>>) attributes {dimension_semantics = [#tpu.dimension_semantics<parallel>], iteration_bounds = array<i64: 1>, scalar_prefetch = 0 : i64, scratch_operands = 0 : i64, tpu.core_type = #tpu.core_type<tc>, window_params = [{transform_indices = @transform_0, window_bounds = array<i64: 8, 256>}, {pipeline_mode = #tpu.pipeline_mode<synchronous>, transform_indices = @transform_1, window_bounds = array<i64: 4, 8, 8>}, {pipeline_mode = #tpu.pipeline_mode<synchronous>, transform_indices = @transform_2, window_bounds = array<i64: 4, 8, 1>}, {transform_indices = @transform_3, window_bounds = array<i64: 8, 256>}]} {
    %c0 = arith.constant 0 : index
    %c0_0 = arith.constant 0 : index
    %0 = vector.load %arg1[%c0, %c0_0] : memref<8x256xbf16, #tpu.memory_space<vmem>>, vector<8x256xbf16>
    %1 = arith.extf %0 : vector<8x256xbf16> to vector<8x256xf32>
    %c0_1 = arith.constant 0 : index
    %c0_2 = arith.constant 0 : index
    %c0_3 = arith.constant 0 : index
    %2 = vector.load %arg2[%c0_1, %c0_2, %c0_3] : memref<4x8x8xbf16, #tpu.memory_space<vmem>>, vector<1x8x1xbf16>
    %3 = vector.shape_cast %2 : vector<1x8x1xbf16> to vector<8x1xbf16>
    %4 = arith.extf %3 : vector<8x1xbf16> to vector<8x1xf32>
    %5 = vector.extract_strided_slice %1 {offsets = [0, 0], sizes = [1, 256], strides = [1, 1]} : vector<8x256xf32> to vector<1x256xf32>
    %6 = vector.broadcast %4 : vector<8x1xf32> to vector<8x256xf32>
    %7 = vector.broadcast %5 : vector<1x256xf32> to vector<8x256xf32>
    %8 = arith.mulf %6, %7 : vector<8x256xf32>
    %c0_4 = arith.constant 0 : index
    %c0_5 = arith.constant 0 : index
    %c1 = arith.constant 1 : index
    %9 = vector.load %arg2[%c0_4, %c0_5, %c1] : memref<4x8x8xbf16, #tpu.memory_space<vmem>>, vector<1x8x1xbf16>
    %10 = vector.shape_cast %9 : vector<1x8x1xbf16> to vector<8x1xbf16>
    %11 = arith.extf %10 : vector<8x1xbf16> to vector<8x1xf32>
    %12 = vector.extract_strided_slice %1 {offsets = [1, 0], sizes = [1, 256], strides = [1, 1]} : vector<8x256xf32> to vector<1x256xf32>
    %13 = vector.broadcast %11 : vector<8x1xf32> to vector<8x256xf32>
    %14 = vector.broadcast %12 : vector<1x256xf32> to vector<8x256xf32>
    %15 = arith.mulf %13, %14 : vector<8x256xf32>
    %16 = arith.addf %8, %15 : vector<8x256xf32>
    %c0_6 = arith.constant 0 : index
    %c0_7 = arith.constant 0 : index
    %c2 = arith.constant 2 : index
    %17 = vector.load %arg2[%c0_6, %c0_7, %c2] : memref<4x8x8xbf16, #tpu.memory_space<vmem>>, vector<1x8x1xbf16>
    %18 = vector.shape_cast %17 : vector<1x8x1xbf16> to vector<8x1xbf16>
    %19 = arith.extf %18 : vector<8x1xbf16> to vector<8x1xf32>
    %20 = vector.extract_strided_slice %1 {offsets = [2, 0], sizes = [1, 256], strides = [1, 1]} : vector<8x256xf32> to vector<1x256xf32>
    %21 = vector.broadcast %19 : vector<8x1xf32> to vector<8x256xf32>
    %22 = vector.broadcast %20 : vector<1x256xf32> to vector<8x256xf32>
    %23 = arith.mulf %21, %22 : vector<8x256xf32>
    %24 = arith.addf %16, %23 : vector<8x256xf32>
    %c0_8 = arith.constant 0 : index
    %c0_9 = arith.constant 0 : index
    %c0_10 = arith.constant 0 : index
    %25 = vector.load %arg3[%c0_8, %c0_9, %c0_10] : memref<4x8x1xf32, #tpu.memory_space<vmem>>, vector<1x8x1xf32>
    %26 = vector.shape_cast %25 : vector<1x8x1xf32> to vector<8x1xf32>
    %27 = vector.broadcast %26 : vector<8x1xf32> to vector<8x256xf32>
    %28 = arith.addf %24, %27 : vector<8x256xf32>
    %29 = math.tanh %28 : vector<8x256xf32>
    %c1_11 = arith.constant 1 : index
    %c0_12 = arith.constant 0 : index
    %c0_13 = arith.constant 0 : index
    %30 = vector.load %arg2[%c1_11, %c0_12, %c0_13] : memref<4x8x8xbf16, #tpu.memory_space<vmem>>, vector<1x8x1xbf16>
    %31 = vector.shape_cast %30 : vector<1x8x1xbf16> to vector<8x1xbf16>
    %32 = arith.extf %31 : vector<8x1xbf16> to vector<8x1xf32>
    %33 = vector.extract_strided_slice %29 {offsets = [0, 0], sizes = [1, 256], strides = [1, 1]} : vector<8x256xf32> to vector<1x256xf32>
    %34 = vector.broadcast %32 : vector<8x1xf32> to vector<8x256xf32>
    %35 = vector.broadcast %33 : vector<1x256xf32> to vector<8x256xf32>
    %36 = arith.mulf %34, %35 : vector<8x256xf32>
    %c1_14 = arith.constant 1 : index
    %c0_15 = arith.constant 0 : index
    %c1_16 = arith.constant 1 : index
    %37 = vector.load %arg2[%c1_14, %c0_15, %c1_16] : memref<4x8x8xbf16, #tpu.memory_space<vmem>>, vector<1x8x1xbf16>
    %38 = vector.shape_cast %37 : vector<1x8x1xbf16> to vector<8x1xbf16>
    %39 = arith.extf %38 : vector<8x1xbf16> to vector<8x1xf32>
    %40 = vector.extract_strided_slice %29 {offsets = [1, 0], sizes = [1, 256], strides = [1, 1]} : vector<8x256xf32> to vector<1x256xf32>
    %41 = vector.broadcast %39 : vector<8x1xf32> to vector<8x256xf32>
    %42 = vector.broadcast %40 : vector<1x256xf32> to vector<8x256xf32>
    %43 = arith.mulf %41, %42 : vector<8x256xf32>
    %44 = arith.addf %36, %43 : vector<8x256xf32>
    %c1_17 = arith.constant 1 : index
    %c0_18 = arith.constant 0 : index
    %c2_19 = arith.constant 2 : index
    %45 = vector.load %arg2[%c1_17, %c0_18, %c2_19] : memref<4x8x8xbf16, #tpu.memory_space<vmem>>, vector<1x8x1xbf16>
    %46 = vector.shape_cast %45 : vector<1x8x1xbf16> to vector<8x1xbf16>
    %47 = arith.extf %46 : vector<8x1xbf16> to vector<8x1xf32>
    %48 = vector.extract_strided_slice %29 {offsets = [2, 0], sizes = [1, 256], strides = [1, 1]} : vector<8x256xf32> to vector<1x256xf32>
    %49 = vector.broadcast %47 : vector<8x1xf32> to vector<8x256xf32>
    %50 = vector.broadcast %48 : vector<1x256xf32> to vector<8x256xf32>
    %51 = arith.mulf %49, %50 : vector<8x256xf32>
    %52 = arith.addf %44, %51 : vector<8x256xf32>
    %c1_20 = arith.constant 1 : index
    %c0_21 = arith.constant 0 : index
    %c3 = arith.constant 3 : index
    %53 = vector.load %arg2[%c1_20, %c0_21, %c3] : memref<4x8x8xbf16, #tpu.memory_space<vmem>>, vector<1x8x1xbf16>
    %54 = vector.shape_cast %53 : vector<1x8x1xbf16> to vector<8x1xbf16>
    %55 = arith.extf %54 : vector<8x1xbf16> to vector<8x1xf32>
    %56 = vector.extract_strided_slice %29 {offsets = [3, 0], sizes = [1, 256], strides = [1, 1]} : vector<8x256xf32> to vector<1x256xf32>
    %57 = vector.broadcast %55 : vector<8x1xf32> to vector<8x256xf32>
    %58 = vector.broadcast %56 : vector<1x256xf32> to vector<8x256xf32>
    %59 = arith.mulf %57, %58 : vector<8x256xf32>
    %60 = arith.addf %52, %59 : vector<8x256xf32>
    %c1_22 = arith.constant 1 : index
    %c0_23 = arith.constant 0 : index
    %c4 = arith.constant 4 : index
    %61 = vector.load %arg2[%c1_22, %c0_23, %c4] : memref<4x8x8xbf16, #tpu.memory_space<vmem>>, vector<1x8x1xbf16>
    %62 = vector.shape_cast %61 : vector<1x8x1xbf16> to vector<8x1xbf16>
    %63 = arith.extf %62 : vector<8x1xbf16> to vector<8x1xf32>
    %64 = vector.extract_strided_slice %29 {offsets = [4, 0], sizes = [1, 256], strides = [1, 1]} : vector<8x256xf32> to vector<1x256xf32>
    %65 = vector.broadcast %63 : vector<8x1xf32> to vector<8x256xf32>
    %66 = vector.broadcast %64 : vector<1x256xf32> to vector<8x256xf32>
    %67 = arith.mulf %65, %66 : vector<8x256xf32>
    %68 = arith.addf %60, %67 : vector<8x256xf32>
    %c1_24 = arith.constant 1 : index
    %c0_25 = arith.constant 0 : index
    %c0_26 = arith.constant 0 : index
    %69 = vector.load %arg3[%c1_24, %c0_25, %c0_26] : memref<4x8x1xf32, #tpu.memory_space<vmem>>, vector<1x8x1xf32>
    %70 = vector.shape_cast %69 : vector<1x8x1xf32> to vector<8x1xf32>
    %71 = vector.broadcast %70 : vector<8x1xf32> to vector<8x256xf32>
    %72 = arith.addf %68, %71 : vector<8x256xf32>
    %73 = math.tanh %72 : vector<8x256xf32>
    %c2_27 = arith.constant 2 : index
    %c0_28 = arith.constant 0 : index
    %c0_29 = arith.constant 0 : index
    %74 = vector.load %arg2[%c2_27, %c0_28, %c0_29] : memref<4x8x8xbf16, #tpu.memory_space<vmem>>, vector<1x8x1xbf16>
    %75 = vector.shape_cast %74 : vector<1x8x1xbf16> to vector<8x1xbf16>
    %76 = arith.extf %75 : vector<8x1xbf16> to vector<8x1xf32>
    %77 = vector.extract_strided_slice %73 {offsets = [0, 0], sizes = [1, 256], strides = [1, 1]} : vector<8x256xf32> to vector<1x256xf32>
    %78 = vector.broadcast %76 : vector<8x1xf32> to vector<8x256xf32>
    %79 = vector.broadcast %77 : vector<1x256xf32> to vector<8x256xf32>
    %80 = arith.mulf %78, %79 : vector<8x256xf32>
    %c2_30 = arith.constant 2 : index
    %c0_31 = arith.constant 0 : index
    %c1_32 = arith.constant 1 : index
    %81 = vector.load %arg2[%c2_30, %c0_31, %c1_32] : memref<4x8x8xbf16, #tpu.memory_space<vmem>>, vector<1x8x1xbf16>
    %82 = vector.shape_cast %81 : vector<1x8x1xbf16> to vector<8x1xbf16>
    %83 = arith.extf %82 : vector<8x1xbf16> to vector<8x1xf32>
    %84 = vector.extract_strided_slice %73 {offsets = [1, 0], sizes = [1, 256], strides = [1, 1]} : vector<8x256xf32> to vector<1x256xf32>
    %85 = vector.broadcast %83 : vector<8x1xf32> to vector<8x256xf32>
    %86 = vector.broadcast %84 : vector<1x256xf32> to vector<8x256xf32>
    %87 = arith.mulf %85, %86 : vector<8x256xf32>
    %88 = arith.addf %80, %87 : vector<8x256xf32>
    %c2_33 = arith.constant 2 : index
    %c0_34 = arith.constant 0 : index
    %c2_35 = arith.constant 2 : index
    %89 = vector.load %arg2[%c2_33, %c0_34, %c2_35] : memref<4x8x8xbf16, #tpu.memory_space<vmem>>, vector<1x8x1xbf16>
    %90 = vector.shape_cast %89 : vector<1x8x1xbf16> to vector<8x1xbf16>
    %91 = arith.extf %90 : vector<8x1xbf16> to vector<8x1xf32>
    %92 = vector.extract_strided_slice %73 {offsets = [2, 0], sizes = [1, 256], strides = [1, 1]} : vector<8x256xf32> to vector<1x256xf32>
    %93 = vector.broadcast %91 : vector<8x1xf32> to vector<8x256xf32>
    %94 = vector.broadcast %92 : vector<1x256xf32> to vector<8x256xf32>
    %95 = arith.mulf %93, %94 : vector<8x256xf32>
    %96 = arith.addf %88, %95 : vector<8x256xf32>
    %c2_36 = arith.constant 2 : index
    %c0_37 = arith.constant 0 : index
    %c3_38 = arith.constant 3 : index
    %97 = vector.load %arg2[%c2_36, %c0_37, %c3_38] : memref<4x8x8xbf16, #tpu.memory_space<vmem>>, vector<1x8x1xbf16>
    %98 = vector.shape_cast %97 : vector<1x8x1xbf16> to vector<8x1xbf16>
    %99 = arith.extf %98 : vector<8x1xbf16> to vector<8x1xf32>
    %100 = vector.extract_strided_slice %73 {offsets = [3, 0], sizes = [1, 256], strides = [1, 1]} : vector<8x256xf32> to vector<1x256xf32>
    %101 = vector.broadcast %99 : vector<8x1xf32> to vector<8x256xf32>
    %102 = vector.broadcast %100 : vector<1x256xf32> to vector<8x256xf32>
    %103 = arith.mulf %101, %102 : vector<8x256xf32>
    %104 = arith.addf %96, %103 : vector<8x256xf32>
    %c2_39 = arith.constant 2 : index
    %c0_40 = arith.constant 0 : index
    %c4_41 = arith.constant 4 : index
    %105 = vector.load %arg2[%c2_39, %c0_40, %c4_41] : memref<4x8x8xbf16, #tpu.memory_space<vmem>>, vector<1x8x1xbf16>
    %106 = vector.shape_cast %105 : vector<1x8x1xbf16> to vector<8x1xbf16>
    %107 = arith.extf %106 : vector<8x1xbf16> to vector<8x1xf32>
    %108 = vector.extract_strided_slice %73 {offsets = [4, 0], sizes = [1, 256], strides = [1, 1]} : vector<8x256xf32> to vector<1x256xf32>
    %109 = vector.broadcast %107 : vector<8x1xf32> to vector<8x256xf32>
    %110 = vector.broadcast %108 : vector<1x256xf32> to vector<8x256xf32>
    %111 = arith.mulf %109, %110 : vector<8x256xf32>
    %112 = arith.addf %104, %111 : vector<8x256xf32>
    %c2_42 = arith.constant 2 : index
    %c0_43 = arith.constant 0 : index
    %c0_44 = arith.constant 0 : index
    %113 = vector.load %arg3[%c2_42, %c0_43, %c0_44] : memref<4x8x1xf32, #tpu.memory_space<vmem>>, vector<1x8x1xf32>
    %114 = vector.shape_cast %113 : vector<1x8x1xf32> to vector<8x1xf32>
    %115 = vector.broadcast %114 : vector<8x1xf32> to vector<8x256xf32>
    %116 = arith.addf %112, %115 : vector<8x256xf32>
    %117 = math.tanh %116 : vector<8x256xf32>
    %c3_45 = arith.constant 3 : index
    %c0_46 = arith.constant 0 : index
    %c0_47 = arith.constant 0 : index
    %118 = vector.load %arg2[%c3_45, %c0_46, %c0_47] : memref<4x8x8xbf16, #tpu.memory_space<vmem>>, vector<1x8x1xbf16>
    %119 = vector.shape_cast %118 : vector<1x8x1xbf16> to vector<8x1xbf16>
    %120 = arith.extf %119 : vector<8x1xbf16> to vector<8x1xf32>
    %121 = vector.extract_strided_slice %117 {offsets = [0, 0], sizes = [1, 256], strides = [1, 1]} : vector<8x256xf32> to vector<1x256xf32>
    %122 = vector.broadcast %120 : vector<8x1xf32> to vector<8x256xf32>
    %123 = vector.broadcast %121 : vector<1x256xf32> to vector<8x256xf32>
    %124 = arith.mulf %122, %123 : vector<8x256xf32>
    %c3_48 = arith.constant 3 : index
    %c0_49 = arith.constant 0 : index
    %c1_50 = arith.constant 1 : index
    %125 = vector.load %arg2[%c3_48, %c0_49, %c1_50] : memref<4x8x8xbf16, #tpu.memory_space<vmem>>, vector<1x8x1xbf16>
    %126 = vector.shape_cast %125 : vector<1x8x1xbf16> to vector<8x1xbf16>
    %127 = arith.extf %126 : vector<8x1xbf16> to vector<8x1xf32>
    %128 = vector.extract_strided_slice %117 {offsets = [1, 0], sizes = [1, 256], strides = [1, 1]} : vector<8x256xf32> to vector<1x256xf32>
    %129 = vector.broadcast %127 : vector<8x1xf32> to vector<8x256xf32>
    %130 = vector.broadcast %128 : vector<1x256xf32> to vector<8x256xf32>
    %131 = arith.mulf %129, %130 : vector<8x256xf32>
    %132 = arith.addf %124, %131 : vector<8x256xf32>
    %c3_51 = arith.constant 3 : index
    %c0_52 = arith.constant 0 : index
    %c2_53 = arith.constant 2 : index
    %133 = vector.load %arg2[%c3_51, %c0_52, %c2_53] : memref<4x8x8xbf16, #tpu.memory_space<vmem>>, vector<1x8x1xbf16>
    %134 = vector.shape_cast %133 : vector<1x8x1xbf16> to vector<8x1xbf16>
    %135 = arith.extf %134 : vector<8x1xbf16> to vector<8x1xf32>
    %136 = vector.extract_strided_slice %117 {offsets = [2, 0], sizes = [1, 256], strides = [1, 1]} : vector<8x256xf32> to vector<1x256xf32>
    %137 = vector.broadcast %135 : vector<8x1xf32> to vector<8x256xf32>
    %138 = vector.broadcast %136 : vector<1x256xf32> to vector<8x256xf32>
    %139 = arith.mulf %137, %138 : vector<8x256xf32>
    %140 = arith.addf %132, %139 : vector<8x256xf32>
    %c3_54 = arith.constant 3 : index
    %c0_55 = arith.constant 0 : index
    %c3_56 = arith.constant 3 : index
    %141 = vector.load %arg2[%c3_54, %c0_55, %c3_56] : memref<4x8x8xbf16, #tpu.memory_space<vmem>>, vector<1x8x1xbf16>
    %142 = vector.shape_cast %141 : vector<1x8x1xbf16> to vector<8x1xbf16>
    %143 = arith.extf %142 : vector<8x1xbf16> to vector<8x1xf32>
    %144 = vector.extract_strided_slice %117 {offsets = [3, 0], sizes = [1, 256], strides = [1, 1]} : vector<8x256xf32> to vector<1x256xf32>
    %145 = vector.broadcast %143 : vector<8x1xf32> to vector<8x256xf32>
    %146 = vector.broadcast %144 : vector<1x256xf32> to vector<8x256xf32>
    %147 = arith.mulf %145, %146 : vector<8x256xf32>
    %148 = arith.addf %140, %147 : vector<8x256xf32>
    %c3_57 = arith.constant 3 : index
    %c0_58 = arith.constant 0 : index
    %c4_59 = arith.constant 4 : index
    %149 = vector.load %arg2[%c3_57, %c0_58, %c4_59] : memref<4x8x8xbf16, #tpu.memory_space<vmem>>, vector<1x8x1xbf16>
    %150 = vector.shape_cast %149 : vector<1x8x1xbf16> to vector<8x1xbf16>
    %151 = arith.extf %150 : vector<8x1xbf16> to vector<8x1xf32>
    %152 = vector.extract_strided_slice %117 {offsets = [4, 0], sizes = [1, 256], strides = [1, 1]} : vector<8x256xf32> to vector<1x256xf32>
    %153 = vector.broadcast %151 : vector<8x1xf32> to vector<8x256xf32>
    %154 = vector.broadcast %152 : vector<1x256xf32> to vector<8x256xf32>
    %155 = arith.mulf %153, %154 : vector<8x256xf32>
    %156 = arith.addf %148, %155 : vector<8x256xf32>
    %c3_60 = arith.constant 3 : index
    %c0_61 = arith.constant 0 : index
    %c0_62 = arith.constant 0 : index
    %157 = vector.load %arg3[%c3_60, %c0_61, %c0_62] : memref<4x8x1xf32, #tpu.memory_space<vmem>>, vector<1x8x1xf32>
    %158 = vector.shape_cast %157 : vector<1x8x1xf32> to vector<8x1xf32>
    %159 = vector.broadcast %158 : vector<8x1xf32> to vector<8x256xf32>
    %160 = arith.addf %156, %159 : vector<8x256xf32>
    %161 = math.tanh %160 : vector<8x256xf32>
    %c0_63 = arith.constant 0 : index
    %c0_64 = arith.constant 0 : index
    %162 = vector.load %arg4[%c0_63, %c0_64] : memref<8x256xf32, #tpu.memory_space<vmem>>, vector<8x256xf32>
    tpu.vector_store %arg4[%c0_63, %c0_64], %161 {strides = array<i32>} : memref<8x256xf32, #tpu.memory_space<vmem>>, vector<8x256xf32>,
    return
  }
  func.func @transform_0(%arg0: i32) -> (i32, i32) {
    %c0_i32 = arith.constant 0 : i32
    %c0_i32_0 = arith.constant 0 : i32
    return %c0_i32, %arg0 : i32, i32
  }
  func.func @transform_1(%arg0: i32) -> (i32, i32, i32) {
    %c0_i32 = arith.constant 0 : i32
    %c0_i32_0 = arith.constant 0 : i32
    %c0_i32_1 = arith.constant 0 : i32
    %c0_i32_2 = arith.constant 0 : i32
    return %c0_i32, %c0_i32_0, %c0_i32_1 : i32, i32, i32
  }
  func.func @transform_2(%arg0: i32) -> (i32, i32, i32) {
    %c0_i32 = arith.constant 0 : i32
    %c0_i32_0 = arith.constant 0 : i32
    %c0_i32_1 = arith.constant 0 : i32
    %c0_i32_2 = arith.constant 0 : i32
    return %c0_i32, %c0_i32_0, %c0_i32_1 : i32, i32, i32
  }
  func.func @transform_3(%arg0: i32) -> (i32, i32) {
    %c0_i32 = arith.constant 0 : i32
    %c0_i32_0 = arith.constant 0 : i32
    return %c0_i32, %arg0 : i32, i32
  }
}

</mosaic_0001>

<bundles_post_ra>
// kernel: dqn_forward.1
= control target key start
LH: loop header
LB: loop body
LE: loop exit
PB: predicated region body
PF: predicated region fallthrough
CT: control target
= control target key end

     0   :  { %v319_v0 = vmov 2   ;;  %v320_v1 = vmov 0   ;;  %v321_v6 = vmov 3   ;;  %v322_v11 = vmov 1   ;;  %s375_s1 = inlined_call_operand.vmem [shape: bf16[4,8,8], index: 1, kind: input, shape index: {}]   ;;  %s376_s2 = inlined_call_operand.vmem [shape: f32[4,8,1], index: 2, kind: input, shape index: {}]   ;;  %s377_s0 = inlined_call_operand.vmem [shape: bf16[8,256], index: 0, kind: input, shape index: {}]   ;;  %s378_s3 = inlined_call_operand.vmem [shape: f32[8,256], index: 3, kind: output, shape index: {}]  }
   0x1   :  { %276 = vset.pattern.permute.xlu1 %v319_v0  ;;  %264 = vset.pattern.permute.xlu0 %v320_v1  ;;  %v17_v2 = vld [vmem:[%s375_s1] sm:$0xff]   ;;  %v255_v5 = vld [vmem:[%s375_s1 + $0x8] sm:$0xff]   ;;  %v323_v12 = vmov 4   ;;  %v256_v16 = vld [vmem:[%s376_s2 + $0x10] sm:$0xff] }
   0x2   :  { %v18_v3 = vunpack.c.l.bf16 %v17_v2  ;;  %v60_v4 = vunpack.c.h.bf16 %v17_v2  ;;  %283 = vset.pattern.permute.xlu2 %v321_v6  ;;  %v123_v7 = vunpack.c.l.bf16 %v255_v5  ;;  %v48_v10 = vld [vmem:[%s376_s2] sm:$0xff]  ;;  %v186_v13 = vunpack.c.h.bf16 %v255_v5  ;;  %v254_v14 = vld [vmem:[%s376_s2 + $0x8] sm:$0xff]  ;;  %v258_v17 = vld [vmem:[%s376_s2 + $0x18] sm:$0xff] }
   0x3   :  { %v14_v19 = vld [vmem:[%s377_s0] sm:$0xff] }
   0x4   :  { %v277_v8 = vpack.i.bf16 %v60_v4, %v18_v3  ;;  %v284_v9 = vpack.i.bf16 %v123_v7, %v60_v4  ;;  %v291_v15 = vpack.i.bf16 %v186_v13, %v123_v7  ;;  %v15_v20 = vunpack.c.l.bf16 %v14_v19 }
   0x5   :  { %v16_v21 = vunpack.c.h.bf16 %v14_v19 }
   0x6   :  { %278 = vperm.xlu1 %276, %v277_v8   ;;  %266 = vperm.xlu0 %264, %v277_v8   ;;  %v24_v22 = vperm.slane %v15_v20, 0  ;;  %v32_v26 = vperm.slane %v15_v20, 1  ;;  %v42_v30 = vperm.slane %v15_v20, 2 }
   0x7   :  { %285 = vperm.xlu2 %283, %v284_v9   ;;  %v25_v25 = vperm.slane %v16_v21, 0  ;;  %v33_v27 = vperm.slane %v16_v21, 1  ;;  %v43_v31 = vperm.slane %v16_v21, 2 }
   0xe   :  { %282 = vset.pattern.permute.xlu1 %v320_v1  ;;  %270 = vset.pattern.permute.xlu0 %v322_v11 }
   0xf   :  { %51 = vperm.xlu1 %282, %v48_v10   ;;  %272 = vperm.xlu0 %270, %v277_v8  }
  0x10   :  { %289 = vset.pattern.permute.xlu2 %v323_v12 }
  0x11   :  { %101 = vperm.xlu2 %289, %v60_v4  }
  0x17   :  { %114 = vperm.xlu1 %282, %v254_v14   ;;  %134 = vperm.xlu0 %270, %v123_v7  }
  0x19   :  { %290 = vset.pattern.permute.xlu2 %v320_v1 }
  0x1a   :  { %292 = vperm.xlu2 %290, %v291_v15  }
  0x1f   :  { %296 = vset.pattern.permute.xlu1 %v319_v0  ;;  %298 = vset.pattern.permute.xlu0 %v320_v1 }
  0x20   :  { %144 = vperm.xlu1 %296, %v123_v7   ;;  %177 = vperm.xlu0 %298, %v256_v16  }
  0x22   :  { %297 = vset.pattern.permute.xlu2 %v323_v12 }
  0x23   :  { %164 = vperm.xlu2 %297, %v123_v7  }
  0x28   :  { %240 = vperm.xlu0 %298, %v258_v17   ;;  %299 = vset.pattern.permute.xlu1 %v322_v11 }
  0x29   :  { %197 = vperm.xlu1 %299, %v186_v13  }
  0x2b   :  { %300 = vset.pattern.permute.xlu2 %v319_v0 }
  0x2c   :  { %207 = vperm.xlu2 %300, %v186_v13  }
  0x31   :  { %301 = vset.pattern.permute.xlu1 %v321_v6 }
  0x32   :  { %217 = vperm.xlu1 %301, %v186_v13  }
  0x34   :  { %302 = vset.pattern.permute.xlu2 %v323_v12 }
  0x35   :  { %227 = vperm.xlu2 %302, %v186_v13  }
  0x61   :  { %v365_v46 = vpop.permute.xlu2 %285 }
  0x62   :  { %v287_v56 = vunpack.i.l.bf16 %v365_v46 }
  0x6b   :  { %v102_v5 = vpop.permute.xlu2 %101 }
  0x74   :  { %v293_v21 = vpop.permute.xlu2 %292 }
  0x78   :  { %v267_v18 = vpop.permute.xlu0 %266  ;;  %v279_v23 = vpop.permute.xlu1 %278 }
  0x79   :  { %v268_v24 = vunpack.i.l.bf16 %v267_v18  ;;  %v280_v29 = vunpack.i.l.bf16 %v279_v23  ;;  %v269_v48 = vunpack.i.h.bf16 %v267_v18  ;;  %v281_v58 = vunpack.i.h.bf16 %v279_v23 }
  0x7b   :  { %v26_v33 = vmul.f32 %v268_v24, %v24_v22  ;;  %v27_v34 = vmul.f32 %v268_v24, %v25_v25  ;;  %v44_v37 = vmul.f32 %v280_v29, %v42_v30  ;;  %v45_v38 = vmul.f32 %v280_v29, %v43_v31 }
  0x7c   :  { %v294_v22 = vunpack.i.l.bf16 %v293_v21 }
  0x81   :  { %v273_v28 = vpop.permute.xlu0 %272  ;;  %v52_v43 = vpop.permute.xlu1 %51 }
  0x82   :  { %v274_v32 = vunpack.i.l.bf16 %v273_v28  ;;  %v275_v50 = vunpack.i.h.bf16 %v273_v28 }
  0x84   :  { %v34_v35 = vmul.f32 %v274_v32, %v32_v26  ;;  %v35_v36 = vmul.f32 %v274_v32, %v33_v27 }
  0x86   :  { %v36_v39 = vadd.f32 %v34_v35, %v26_v33  ;;  %v37_v40 = vadd.f32 %v35_v36, %v27_v34  ;;  %v288_v35 = vunpack.i.h.bf16 %v365_v46 }
  0x88   :  { %v46_v41 = vadd.f32 %v44_v37, %v36_v39  ;;  %v47_v42 = vadd.f32 %v45_v38, %v37_v40 }
  0x89   :  { %v115_v17 = vpop.permute.xlu1 %114  ;;  %v135_v28 = vpop.permute.xlu0 %134 }
  0x8a   :  { %v54_v44 = vadd.f32 %v52_v43, %v46_v41  ;;  %v55_v45 = vadd.f32 %v52_v43, %v47_v42  ;;  %v165_v43 = vpop.permute.xlu2 %164 }
  0x8c   :  { %303 = vtanh.f32 %v54_v44 }
  0x8d   :  { %305 = vtanh.f32 %v55_v45 }
  0x92   :  { %v304_v47 = vpop.eup %303  ;;  %v145_v30 = vpop.permute.xlu1 %144 }
  0x93   :  { %v306_v49 = vpop.eup %305  ;;  %v66_v51 = vperm.slane %v304_v47, 0  ;;  %v74_v52 = vperm.slane %v304_v47, 1  ;;  %v84_v53 = vperm.slane %v304_v47, 2  ;;  %v94_v61 = vperm.slane %v304_v47, 3 }
  0x94   :  { %v67_v54 = vperm.slane %v306_v49, 0  ;;  %v75_v55 = vperm.slane %v306_v49, 1  ;;  %v85_v57 = vperm.slane %v306_v49, 2  ;;  %v95_v0 = vperm.slane %v306_v49, 3 }
  0x95   :  { %v68_v59 = vmul.f32 %v269_v48, %v66_v51  ;;  %v76_v60 = vmul.f32 %v275_v50, %v74_v52  ;;  %v86_v2 = vmul.f32 %v281_v58, %v84_v53  ;;  %v104_v3 = vperm.slane %v304_v47, 4 }
  0x96   :  { %v69_v62 = vmul.f32 %v269_v48, %v67_v54  ;;  %v77_v63 = vmul.f32 %v275_v50, %v75_v55  ;;  %v87_v6 = vmul.f32 %v281_v58, %v85_v57  ;;  %v105_v7 = vperm.slane %v306_v49, 4 }
  0x97   :  { %v78_v1 = vadd.f32 %v76_v60, %v68_v59  ;;  %v96_v8 = vmul.f32 %v287_v56, %v94_v61  ;;  %v97_v10 = vmul.f32 %v287_v56, %v95_v0  ;;  %v106_v13 = vmul.f32 %v104_v3, %v102_v5  ;;  %v178_v56 = vpop.permute.xlu0 %177  ;;  %v208_v61 = vpop.permute.xlu2 %207 }
  0x98   :  { %v79_v4 = vadd.f32 %v77_v63, %v69_v62  ;;  %v107_v15 = vmul.f32 %v105_v7, %v102_v5  ;;  %v295_v0 = vunpack.i.h.bf16 %v293_v21 }
  0x99   :  { %v88_v9 = vadd.f32 %v86_v2, %v78_v1 }
  0x9a   :  { %v89_v11 = vadd.f32 %v87_v6, %v79_v4 }
  0x9b   :  { %v98_v12 = vadd.f32 %v96_v8, %v88_v9  ;;  %v198_v60 = vpop.permute.xlu1 %197 }
  0x9c   :  { %v99_v14 = vadd.f32 %v97_v10, %v89_v11 }
  0x9d   :  { %v108_v16 = vadd.f32 %v106_v13, %v98_v12 }
  0x9e   :  { %v109_v18 = vadd.f32 %v107_v15, %v99_v14 }
  0x9f   :  { %v117_v19 = vadd.f32 %v115_v17, %v108_v16 }
  0xa0   :  { %v118_v20 = vadd.f32 %v115_v17, %v109_v18 }
  0xa1   :  { %307 = vtanh.f32 %v117_v19  ;;  %v228_v19 = vpop.permute.xlu2 %227 }
  0xa2   :  { %309 = vtanh.f32 %v118_v20 }
  0xa4   :  { %v218_v12 = vpop.permute.xlu1 %217 }
  0xa7   :  { %v308_v23 = vpop.eup %307 }
  0xa8   :  { %v310_v24 = vpop.eup %309  ;;  %v129_v25 = vperm.slane %v308_v23, 0  ;;  %v137_v26 = vperm.slane %v308_v23, 1  ;;  %v147_v27 = vperm.slane %v308_v23, 2  ;;  %v167_v37 = vperm.slane %v308_v23, 4 }
  0xa9   :  { %v130_v29 = vperm.slane %v310_v24, 0  ;;  %v138_v31 = vperm.slane %v310_v24, 1  ;;  %v148_v32 = vperm.slane %v310_v24, 2  ;;  %v157_v41 = vperm.slane %v308_v23, 3 }
  0xaa   :  { %v131_v33 = vmul.f32 %v294_v22, %v129_v25  ;;  %v139_v34 = vmul.f32 %v137_v26, %v135_v28  ;;  %v149_v40 = vmul.f32 %v147_v27, %v145_v30  ;;  %v158_v42 = vperm.slane %v310_v24, 3 }
  0xab   :  { %v132_v36 = vmul.f32 %v294_v22, %v130_v29  ;;  %v140_v38 = vmul.f32 %v138_v31, %v135_v28  ;;  %v168_v44 = vperm.slane %v310_v24, 4  ;;  %v150_v47 = vmul.f32 %v148_v32, %v145_v30  ;;  %v241_v30 = vpop.permute.xlu0 %240 }
  0xac   :  { %v141_v39 = vadd.f32 %v139_v34, %v131_v33  ;;  %v159_v49 = vmul.f32 %v288_v35, %v157_v41  ;;  %v160_v51 = vmul.f32 %v288_v35, %v158_v42  ;;  %v169_v52 = vmul.f32 %v167_v37, %v165_v43 }
  0xad   :  { %v142_v45 = vadd.f32 %v140_v38, %v132_v36  ;;  %v170_v54 = vmul.f32 %v168_v44, %v165_v43 }
  0xae   :  { %v151_v48 = vadd.f32 %v149_v40, %v141_v39 }
  0xaf   :  { %v152_v50 = vadd.f32 %v150_v47, %v142_v45 }
  0xb0   :  { %v161_v53 = vadd.f32 %v159_v49, %v151_v48 }
  0xb1   :  { %v162_v55 = vadd.f32 %v160_v51, %v152_v50 }
  0xb2   :  { %v171_v46 = vadd.f32 %v169_v52, %v161_v53 }
  0xb3   :  { %v172_v57 = vadd.f32 %v170_v54, %v162_v55 }
  0xb4   :  { %v180_v58 = vadd.f32 %v178_v56, %v171_v46 }
  0xb5   :  { %v181_v59 = vadd.f32 %v178_v56, %v172_v57 }
  0xb6   :  { %311 = vtanh.f32 %v180_v58 }
  0xb7   :  { %313 = vtanh.f32 %v181_v59 }
  0xbc   :  { %v312_v62 = vpop.eup %311 }
  0xbd   :  { %v314_v63 = vpop.eup %313  ;;  %v210_v1 = vperm.slane %v312_v62, 2  ;;  %v192_v2 = vperm.slane %v312_v62, 0  ;;  %v200_v3 = vperm.slane %v312_v62, 1  ;;  %v230_v11 = vperm.slane %v312_v62, 4 }
  0xbe   :  { %v211_v4 = vperm.slane %v314_v63, 2  ;;  %v193_v5 = vperm.slane %v314_v63, 0  ;;  %v201_v6 = vperm.slane %v314_v63, 1  ;;  %v220_v15 = vperm.slane %v312_v62, 3 }
  0xbf   :  { %v194_v7 = vmul.f32 %v295_v0, %v192_v2  ;;  %v202_v8 = vmul.f32 %v200_v3, %v198_v60  ;;  %v212_v13 = vmul.f32 %v210_v1, %v208_v61  ;;  %v221_v16 = vperm.slane %v314_v63, 3 }
  0xc0   :  { %v195_v9 = vmul.f32 %v295_v0, %v193_v5  ;;  %v203_v10 = vmul.f32 %v201_v6, %v198_v60  ;;  %v213_v17 = vmul.f32 %v211_v4, %v208_v61  ;;  %v231_v20 = vperm.slane %v314_v63, 4 }
  0xc1   :  { %v204_v14 = vadd.f32 %v202_v8, %v194_v7  ;;  %v222_v22 = vmul.f32 %v220_v15, %v218_v12  ;;  %v223_v24 = vmul.f32 %v221_v16, %v218_v12  ;;  %v232_v25 = vmul.f32 %v230_v11, %v228_v19 }
  0xc2   :  { %v205_v18 = vadd.f32 %v203_v10, %v195_v9  ;;  %v233_v27 = vmul.f32 %v231_v20, %v228_v19 }
  0xc3   :  { %v214_v21 = vadd.f32 %v212_v13, %v204_v14 }
  0xc4   :  { %v215_v23 = vadd.f32 %v213_v17, %v205_v18 }
  0xc5   :  { %v224_v26 = vadd.f32 %v222_v22, %v214_v21 }
  0xc6   :  { %v225_v28 = vadd.f32 %v223_v24, %v215_v23 }
  0xc7   :  { %v234_v29 = vadd.f32 %v232_v25, %v224_v26 }
  0xc8   :  { %v235_v31 = vadd.f32 %v233_v27, %v225_v28 }
  0xc9   :  { %v243_v32 = vadd.f32 %v241_v30, %v234_v29 }
  0xca   :  { %v244_v33 = vadd.f32 %v241_v30, %v235_v31 }
  0xcb   :  { %315 = vtanh.f32 %v243_v32 }
  0xcc   :  { %317 = vtanh.f32 %v244_v33 }
  0xd1   :  { %v316_v34 = vpop.eup %315 }
  0xd2   :  { %v318_v35 = vpop.eup %317  ;;  %247 = vst [vmem:[%s378_s3] sm:$0xff] %v316_v34 }
  0xd3   :  { %248 = vst [vmem:[%s378_s3 + $0x8] sm:$0xff] %v318_v35 }

</bundles_post_ra>
